<compile_context>
chip_gen: v7x
topology: tpu7x:2x2x1
jax: 0.10.0
libtpu: 0.0.40
codegen_flags: <defaults>
</compile_context>

<pallas_src>
import functools

import jax
import jax.numpy as jnp
from jax.experimental import pallas as pl
from jax.experimental.pallas import tpu as pltpu


def _gin_block_kernel(x_ref, w_ref, s_ref, o_ref, *scratch, k, nx, ny, ncp,
                      negative_slope, use_act):
    # x_ref: (1, nc, nx*ny)       spatial-in-lanes input for this batch element
    # w_ref: (1, oc, k*k*ncp)     per-batch conv weights, K ordered (dy, dx, c),
    #                             channels zero-padded nc -> ncp
    # s_ref: (1, oc, 1)           per-output-channel shift
    # o_ref: (1, oc, nx*ny)       lane-dense NCHW output tile
    # scratch (k > 1 only): p_ref (k*k*ncp, nx*ny) VMEM im2col patch matrix
    nc = x_ref.shape[1]
    L = nx * ny
    pad = k // 2

    x = x_ref[0]                                           # (nc, L)

    # Pad the channel block to a sublane multiple once, in registers.  The
    # extra rows are zero and the matching weight columns are zero, so the
    # matmul result is unchanged, and every downstream store is 8-aligned.
    if ncp > nc:
        x_pad = jnp.concatenate(
            [x, jnp.zeros((ncp - nc, L), x.dtype)], axis=0)  # (ncp, L)
    else:
        x_pad = x

    if k == 1:
        # 1x1 conv: no im2col, no scratch -- the input tile is the RHS.
        rhs = x_pad                                        # (ncp, L)
    else:
        p_ref = scratch[0]                                 # (k*k*ncp, L)

        # Pre-mask the source per horizontal offset rx so that flat shifting
        # by s = ry*ny + rx never pulls a neighbouring row's pixels across a
        # column wrap.  A destination pixel with an invalid column reads
        # exactly the source columns {col < rx} (rx > 0) or {col >= ny + rx}
        # (rx < 0); those sets are disjoint from what valid destinations read,
        # so zeroing them at the source is equivalent to masking at the
        # destination.  Row overflow falls outside [0, L) in flat coordinates
        # and is handled by the zero fill of the shift itself.
        col = jax.lax.broadcasted_iota(jnp.int32, (1, L), 1) % ny   # (1, L)
        xm = {}
        for rx in range(-pad, pad + 1):
            if rx == 0:
                xm[rx] = x_pad
            else:
                src_valid = jnp.logical_and(col - rx >= 0, col - rx < ny)
                xm[rx] = jnp.where(src_valid, x_pad, jnp.zeros_like(x_pad))

        # Build the im2col patch matrix: tap t = (dy, dx) occupies sublane rows
        # [t*ncp, (t+1)*ncp) -- every store is a full, aligned ncp-row block.
        t = 0
        for dy in range(k):
            for dx in range(k):
                ry, rx = dy - pad, dx - pad
                s = ry * ny + rx
                src = xm[rx]
                if s == 0:
                    tap = src
                elif s > 0:
                    tap = jnp.concatenate(
                        [src[:, s:], jnp.zeros((ncp, s), src.dtype)], axis=1)
                else:
                    tap = jnp.concatenate(
                        [jnp.zeros((ncp, -s), src.dtype), src[:, :s]], axis=1)
                p_ref[pl.ds(t * ncp, ncp), :] = tap        # aligned (ncp, L)
                t += 1
        rhs = p_ref[...]                                   # (k*k*ncp, L)

    # Single K = k*k*ncp matmul on the MXU: (oc, K) @ (K, L) -> (oc, L).
    y = jax.lax.dot_general(
        w_ref[0], rhs,
        dimension_numbers=(((1,), (0,)), ((), ())),
        preferred_element_type=jnp.float32)

    # Epilogue: per-channel shift (broadcast over lanes) + leaky ReLU.
    y = y + s_ref[0]
    if use_act:
        y = jnp.maximum(y, negative_slope * y)
    o_ref[0] = y.astype(o_ref.dtype)


def gin_block_forward(x, ker, shift, k, use_act=True):
    """x: (nb, nc, nx, ny) NCHW; ker: (oc*nb, nc, k, k); shift: (oc*nb, 1, 1)."""
    nb, nc, nx, ny = x.shape
    oc = ker.shape[0] // nb
    L = nx * ny
    ncp = ((nc + 7) // 8) * 8        # channel block padded to a sublane multiple
    K = k * k * ncp

    # ---- glue: pure reshapes / tiny weight reorder (no pad / transpose of x) ----
    x_flat = x.reshape(nb, nc, L)                          # NCHW view, lanes=spatial
    w = ker.reshape(nb, oc, nc, k, k)                      # group b uses ker[b*oc:(b+1)*oc]
    w = jnp.transpose(w, (0, 1, 3, 4, 2))                  # (nb, oc, k, k, nc)
    w = jnp.pad(w, ((0, 0), (0, 0), (0, 0), (0, 0), (0, ncp - nc)))
    w = w.reshape(nb, oc, K)                               # K ordered (dy, dx, c_pad)
    s = shift.reshape(nb, oc, 1)

    kernel = functools.partial(_gin_block_kernel, k=k, nx=nx, ny=ny, ncp=ncp,
                               negative_slope=0.01, use_act=use_act)

    scratch_shapes = [] if k == 1 else [pltpu.VMEM((K, L), x.dtype)]

    out = pl.pallas_call(
        kernel,
        out_shape=jax.ShapeDtypeStruct((nb, oc, L), x.dtype),
        grid=(nb,),
        in_specs=[
            pl.BlockSpec((1, nc, L), lambda b: (b, 0, 0)),
            pl.BlockSpec((1, oc, K), lambda b: (b, 0, 0)),
            pl.BlockSpec((1, oc, 1), lambda b: (b, 0, 0)),
        ],
        out_specs=pl.BlockSpec((1, oc, L), lambda b: (b, 0, 0)),
        scratch_shapes=scratch_shapes,
        compiler_params=pltpu.CompilerParams(
            dimension_semantics=("parallel",)),
    )(x_flat, w, s)

    return out.reshape(nb, oc, nx, ny)                     # pure view reshape


def reference_forward(x, ker, shift, k, use_act=True):
    """Pure-JAX reference matching the PyTorch forward exactly."""
    nb, nc, nx, ny = x.shape
    oc = ker.shape[0] // nb
    pad = k // 2
    x_r = x.reshape(1, nb * nc, nx, ny)
    y = jax.lax.conv_general_dilated(
        x_r, ker, window_strides=(1, 1),
        padding=[(pad, pad), (pad, pad)],
        dimension_numbers=('NCHW', 'OIHW', 'NCHW'),
        feature_group_count=nb)
    y = y + shift[None]
    if use_act:
        y = jnp.where(y > 0, y, 0.01 * y)
    return y.reshape(nb, oc, nx, ny)


if __name__ == "__main__":
    # Module config: out_channel=32, in_channel=3, scale_pool=[1, 3], use_act=True
    out_channel, in_channel = 32, 3
    scale_pool = [1, 3]
    nb, nx, ny = 2, 16, 16

    key = jax.random.PRNGKey(0)
    k_x, k_idx, k_ker, k_shift = jax.random.split(key, 4)

    # input (NCHW, same as PyTorch)
    x = jax.random.normal(k_x, (nb, in_channel, nx, ny), dtype=jnp.float32)

    # the module draws k randomly (torch.randint); resolve to a static int,
    # and also validate every k in the scale pool so both code paths compile.
    k_drawn = scale_pool[int(jax.random.randint(k_idx, (), 0, len(scale_pool)))]

    for k in scale_pool:
        kk_ker, kk_shift = jax.random.fold_in(k_ker, k), jax.random.fold_in(k_shift, k)
        ker = jax.random.normal(kk_ker, (out_channel * nb, in_channel, k, k),
                                dtype=jnp.float32)
        shift = jax.random.normal(kk_shift, (out_channel * nb, 1, 1),
                                  dtype=jnp.float32) * 1.0

        out = jax.block_until_ready(gin_block_forward(x, ker, shift, k, use_act=True))
        ref = jax.block_until_ready(reference_forward(x, ker, shift, k, use_act=True))

        assert out.shape == (nb, out_channel, nx, ny), out.shape
        err = float(jnp.max(jnp.abs(out - ref)))
        assert err < 1e-4, (k, err)

    assert k_drawn in scale_pool
    print("KERNEL_OK")
</pallas_src>

<mosaic_0001>
module attributes {stable_mosaic.version = 11 : i64} {
  func.func @_gin_block_kernel(%arg0: i32, %arg1: memref<1x3x256xf32, #tpu.memory_space<vmem>>, %arg2: memref<1x32x8xf32, #tpu.memory_space<vmem>>, %arg3: memref<1x32x1xf32, #tpu.memory_space<vmem>>, %arg4: memref<1x32x256xf32, #tpu.memory_space<vmem>>) attributes {dimension_semantics = [#tpu.dimension_semantics<parallel>], iteration_bounds = array<i64: 2>, scalar_prefetch = 0 : i64, scratch_operands = 0 : i64, tpu.core_type = #tpu.core_type<tc>, window_params = [{transform_indices = @transform_0, window_bounds = array<i64: 1, 3, 256>}, {transform_indices = @transform_1, window_bounds = array<i64: 1, 32, 8>}, {transform_indices = @transform_2, window_bounds = array<i64: 1, 32, 1>}, {transform_indices = @transform_3, window_bounds = array<i64: 1, 32, 256>}]} {
    %c0 = arith.constant 0 : index
    %c0_0 = arith.constant 0 : index
    %c0_1 = arith.constant 0 : index
    %0 = vector.load %arg1[%c0, %c0_0, %c0_1] : memref<1x3x256xf32, #tpu.memory_space<vmem>>, vector<1x3x256xf32>
    %1 = vector.shape_cast %0 : vector<1x3x256xf32> to vector<3x256xf32>
    %cst = arith.constant 0.000000e+00 : f32
    %2 = vector.broadcast %cst : f32 to vector<5x256xf32>
    %3 = tpu.concatenate %1, %2 in 0 : vector<3x256xf32>, vector<5x256xf32> -> vector<8x256xf32>
    %c0_2 = arith.constant 0 : index
    %c0_3 = arith.constant 0 : index
    %c0_4 = arith.constant 0 : index
    %4 = vector.load %arg2[%c0_2, %c0_3, %c0_4] : memref<1x32x8xf32, #tpu.memory_space<vmem>>, vector<1x32x8xf32>
    %5 = vector.shape_cast %4 : vector<1x32x8xf32> to vector<32x8xf32>
    %cst_5 = arith.constant dense<0.000000e+00> : vector<32x256xf32>
    %6 = tpu.matmul %5, %3, %cst_5 {dimension_numbers = #tpu.dot_dimension_numbers<[1], [0], [0], [1], [0, 0, 1, 1], [], []>} : vector<32x8xf32>, vector<8x256xf32>, vector<32x256xf32> -> vector<32x256xf32>
    %c0_6 = arith.constant 0 : index
    %c0_7 = arith.constant 0 : index
    %c0_8 = arith.constant 0 : index
    %7 = vector.load %arg3[%c0_6, %c0_7, %c0_8] : memref<1x32x1xf32, #tpu.memory_space<vmem>>, vector<1x32x1xf32>
    %8 = vector.shape_cast %7 : vector<1x32x1xf32> to vector<32x1xf32>
    %9 = vector.broadcast %8 : vector<32x1xf32> to vector<32x256xf32>
    %10 = arith.addf %6, %9 : vector<32x256xf32>
    %cst_9 = arith.constant 0.00999999977 : f32
    %11 = vector.broadcast %cst_9 : f32 to vector<32x256xf32>
    %12 = arith.mulf %11, %10 : vector<32x256xf32>
    %13 = arith.maximumf %10, %12 : vector<32x256xf32>
    %c0_10 = arith.constant 0 : index
    %c0_11 = arith.constant 0 : index
    %c0_12 = arith.constant 0 : index
    %14 = vector.load %arg4[%c0_10, %c0_11, %c0_12] : memref<1x32x256xf32, #tpu.memory_space<vmem>>, vector<1x32x256xf32>
    %15 = vector.shape_cast %14 : vector<1x32x256xf32> to vector<32x256xf32>
    %16 = vector.shape_cast %13 : vector<32x256xf32> to vector<1x32x256xf32>
    tpu.vector_store %arg4[%c0_10, %c0_11, %c0_12], %16 {strides = array<i32>} : memref<1x32x256xf32, #tpu.memory_space<vmem>>, vector<1x32x256xf32>,
    return
  }
  func.func @transform_0(%arg0: i32) -> (i32, i32, i32) {
    %c0_i32 = arith.constant 0 : i32
    %c0_i32_0 = arith.constant 0 : i32
    %c0_i32_1 = arith.constant 0 : i32
    return %arg0, %c0_i32, %c0_i32_0 : i32, i32, i32
  }
  func.func @transform_1(%arg0: i32) -> (i32, i32, i32) {
    %c0_i32 = arith.constant 0 : i32
    %c0_i32_0 = arith.constant 0 : i32
    %c0_i32_1 = arith.constant 0 : i32
    return %arg0, %c0_i32, %c0_i32_0 : i32, i32, i32
  }
  func.func @transform_2(%arg0: i32) -> (i32, i32, i32) {
    %c0_i32 = arith.constant 0 : i32
    %c0_i32_0 = arith.constant 0 : i32
    %c0_i32_1 = arith.constant 0 : i32
    return %arg0, %c0_i32, %c0_i32_0 : i32, i32, i32
  }
  func.func @transform_3(%arg0: i32) -> (i32, i32, i32) {
    %c0_i32 = arith.constant 0 : i32
    %c0_i32_0 = arith.constant 0 : i32
    %c0_i32_1 = arith.constant 0 : i32
    return %arg0, %c0_i32, %c0_i32_0 : i32, i32, i32
  }
}

</mosaic_0001>

<bundles_post_ra>
// kernel: tpu_custom_call.1
= control target key start
LH: loop header
LB: loop body
LE: loop exit
PB: predicated region body
PF: predicated region fallthrough
CT: control target
= control target key end

     0   :  { %8 = vsyncpa [#allocation3], 0  ;;  %s750_s0 = inlined_call_operand.vmem [shape: f32[2,3,256], index: 0, kind: input, shape index: {}]   ;;  %s751_s1 = inlined_call_operand.vmem [shape: f32[2,32,8], index: 1, kind: input, shape index: {}]   ;;  %s752_s2 = inlined_call_operand.vmem [shape: f32[2,32,1], index: 2, kind: input, shape index: {}]   ;;  %s753_s3 = inlined_call_operand.hbm [shape: f32[2,32,256], index: 3, kind: output, shape index: {}]  }
   0x1   :  { %10 = vsyncpa [#allocation3 + $0x1], 0  ;;  %s633_s12 = smov 0   ;;  %s635_s13 = smov 0  }
   0x2   :  { %s637_s14 = smov 0   ;;  %s639_s15 = smov 0  }
   0x3 LB: > { %s654_s16 = sadd.s32 4294967295, %s606_s15   ;;  %s470_s17 = sadd.s32 4294967294, %s606_s15   ;;  %s606_s15 = sphi %s639_s15, %s759_s15   ;;  %s602_s14 = sphi %s637_s14, %s758_s14   ;;  %s598_s13 = sphi %s635_s13, %s757_s13   ;;  %s594_s12 = sphi %s633_s12, %s756_s12  }
   0x4   : > { %s658_s18 = sadd.s32 1, %s606_s15   ;;  %s101_s19 = sadd.s32 1, %s602_s14 }
   0x5   : > { %s98_s20 = ssub.s32 %s606_s15, %s658_s18  ;;  %p111_p0 = scmp.ne.s32.totalorder %s602_s14, %s598_s13 }
   0x6   : > { %p99_p1 = scmp.eq.s32.totalorder %s98_s20, 0  ;;  %p112_p2 = scmp.eq.s32.totalorder %s654_s16, 1 }
   0x7   : > { %p117_p3 = scmp.ne.s32.totalorder %s598_s13, %s594_s12  ;;  %p118_p4 = scmp.eq.s32.totalorder %s470_s17, 1 }
   0x8   : > { %s669_s21 = scalar_select %p99_p1, %s602_s14, %s101_s19  }
   0x9   : > { %p671_p5 = por %p112_p2, %p111_p0  ;;  %p675_p6 = por %p118_p4, %p117_p3 }
   0xa   : > { %p473_p7 = scmp.ge.s32.totalorder %s606_s15, 1  ;;  %p160_p8 = scmp.lt.s32.totalorder %s606_s15, 3 }
   0xc   : > { %p161_p9 = pnand %p473_p7, %p160_p8 }
   0xd   : > { %p194_p10 = scmp.lt.s32.totalorder (!%p161_p9), %s654_s16, 1  ;;  %v608_v0 = vmov (!%p161_p9), 0.0   ;;  %v609_v1 = vmov (!%p161_p9), 0   ;;  %vm213_vm0 = vcmask (!%p161_p9), 1042432   ;;  %vm244_vm1 = vcmask (!%p161_p9), 64512   ;;  %s191_s9 = sand.u32 (!%p161_p9), 1, %s598_s13  }
   0xe   : > { %164 = sbr.rel (%p161_p9) target bundleno = 268 (0x10c), region = 32  ;;  %321 = vmatprep.mubr.f32.mxu0 (!%p161_p9), %v608_v0  ;;  %333 = vmatprep.mubr.f32.mxu1 (!%p161_p9), %v608_v0  ;;  %s474_s10 = sshll.u32 (!%p161_p9), %s191_s9, 6 }
   0xf   : > { %542 = vset.pattern.permute.xlu1 (!%p161_p9), %v609_v1  ;;  %541 = vset.pattern.permute.xlu0 (!%p161_p9), %v609_v1  ;;  %s495_s11 = sshll.u32 (!%p161_p9), %s654_s16, 10  ;;  %s193_s17 = scalar_lea.vmem (!%p161_p9), [#allocation2], %s474_s10 }
  0x10   : > { %s384_s19 = sshll.u32 (!%p161_p9), %s193_s17, 4  ;;  %s610_s27 = smov (!%p161_p9), [#allocation2]   ;;  %s705_s19 = int_to_ptr.vmem [resolvable:$true] %s384_s19 }
  0x11   : > { %s548_s28 = sshll.u32 (!%p161_p9), %s610_s27, 4  ;;  %s549_s28 = int_to_ptr.vmem [resolvable:$false] %s548_s28 }
  0x12   : > { %p551_p0 = scmp.lt.s32.totalorder (!%p161_p9), %s705_s19, %s549_s28 }
  0x15   : > { %s195_s24 = scalar_select %p194_p10, %s654_s16, 1 }
  0x16   : > { %s709_s16 = scalar_lea.sflag [#allocation3], %s191_s9 }
  0x17   : > { %s492_s25 = sshll.u32 %s195_s24, 3  ;;  %s493_s26 = sshll.u32 %s195_s24, 5 }
  0x18   : > { %s198_s29 = scalar_lea.vmem %s750_s0, %s492_s25  ;;  %s203_s5 = scalar_lea.vmem %s751_s1, %s493_s26 }
  0x19   : > { %v209_v2 = vld [vmem:[%s198_s29] sm:$0x77]  ;;  %s208_s8 = scalar_lea.vmem %s752_s2, %s493_s26  ;;  %v218_v6 = vld [vmem:[%s203_s5 + $0x10] sm:$0xff]  ;;  %v217_v9 = vld [vmem:[%s203_s5 + $0x8] sm:$0xff]  ;;  %s703_s25 = scalar_lea.hbm %s753_s3, %s495_s11 }
  0x1a   : > { %v211_v3 = vcombine.high %v209_v2, %v209_v2  ;;  %v222_v4 = vld [vmem:[%s208_s8 + $0x10] sm:$0xff]  ;;  %v216_v5 = vld [vmem:[%s203_s5] sm:$0xff]  ;;  %v223_v8 = vld [vmem:[%s208_s8 + $0x18] sm:$0xff]  ;;  %s544_s26 = scalar_lea.vmem %s705_s19, 1024  ;;  %s550_s29 = scalar_lea.vmem %s549_s28, 2048 }
  0x1b   : > { %236 = vperm.xlu1 %542, %v222_v4   ;;  %v220_v7 = vld [vmem:[%s208_s8] sm:$0xff]  ;;  %v219_v10 = vld [vmem:[%s203_s5 + $0x18] sm:$0xff]  ;;  %v221_v11 = vld [vmem:[%s208_s8 + $0x8] sm:$0xff]  ;;  %p545_p11 = scmp.ne.s32.totalorder %s705_s19, %s544_s26  ;;  %p552_p1 = scmp.lt.s32.totalorder %s550_s29, %s544_s26 }
  0x1c   : > { %481 = vmatprep.subr.msk.mxu0 %vm213_vm0, %v211_v3  ;;  %496 = vmatprep.subr.msk.mxu1 %vm213_vm0, %v211_v3 }
  0x1d   : > { %482 = vmatpush1.msk.msra.mxu0 %vm213_vm0, %v209_v2  ;;  %497 = vmatpush1.msk.msra.mxu1 %vm213_vm0, %v209_v2  ;;  %p546_p12 = pnand %p545_p11, %p671_p5  ;;  %p553_p2 = por %p552_p1, %p551_p0 }
  0x1e   : > { %483 = vmatmul.mubr.msk.f32.vlgmr.msra.gmra.mrb[0].mxu0 %vm244_vm1, %v216_v5  ;;  %485 = vmatmul.mubr.msk.f32.vlgmr.msra.gmra.mrb[0].mxu1 %vm244_vm1, %v218_v6 }
  0x1f   : > { %327 = vmatprep.mubr.f32.mxu0 %v608_v0  ;;  %339 = vmatprep.mubr.f32.mxu1 %v608_v0  ;;  %p547_p13 = pneg %p546_p12 }
  0x20   : > { %226 = vperm.xlu0 %541, %v220_v7   ;;  %241 = vperm.xlu1 %542, %v223_v8  }
  0x21   : > { %p554_p3 = pnand %p553_p2, %p547_p13 }
  0x22   : > { %484 = vmatmul.mubr.msk.f32.gmra.mrb[2].mxu0 %vm244_vm1, %v217_v9  ;;  %486 = vmatmul.mubr.msk.f32.gmra.mrb[2].mxu1 %vm244_vm1, %v219_v10 }
  0x24   : > { %231 = vperm.xlu0 %541, %v221_v11  }
  0x9a   : > { %v237_v12 = vpop.permute.xlu1 %236 }
  0x9f   : > { %v227_v13 = vpop.permute.xlu0 %226  ;;  %v242_v24 = vpop.permute.xlu1 %241 }
  0xa3   : > { %v232_v25 = vpop.permute.xlu0 %231 }
  0xf1   : > { %v323_v14 = vpop.f32.mrb[0].mxu0  ;;  %v335_v15 = vpop.f32.mrb[0].mxu1 }
  0xf2   : > { %v324_v16 = vadd.f32 %v323_v14, %v227_v13  ;;  %v336_v17 = vadd.f32 %v335_v15, %v237_v12  ;;  %v325_v18 = vpop.f32.mrb[1].mxu0  ;;  %v337_v19 = vpop.f32.mrb[1].mxu1 }
  0xf3   : > { %v326_v20 = vadd.f32 %v325_v18, %v227_v13  ;;  %v338_v21 = vadd.f32 %v337_v19, %v237_v12 }
  0xf4   : > { %v346_v22 = vmul.f32 0.01, %v324_v16  ;;  %v350_v23 = vmul.f32 0.01, %v336_v17 }
  0xf5   : > { %v347_v26 = vmul.f32 0.01, %v326_v20  ;;  %v351_v27 = vmul.f32 0.01, %v338_v21  ;;  %v329_v28 = vpop.f32.mrb[2].mxu0  ;;  %v341_v29 = vpop.f32.mrb[2].mxu1 }
  0xf6   : > { %v354_v30 = vmax.f32 %v324_v16, %v346_v22  ;;  %v358_v31 = vmax.f32 %v336_v17, %v350_v23  ;;  %v330_v32 = vadd.f32 %v329_v28, %v232_v25  ;;  %v342_v33 = vadd.f32 %v341_v29, %v242_v24  ;;  %v331_v34 = vpop.f32.mrb[3].mxu0  ;;  %v343_v35 = vpop.f32.mrb[3].mxu1 }
  0xf7   : > { %v355_v36 = vmax.f32 %v326_v20, %v347_v26  ;;  %v359_v37 = vmax.f32 %v338_v21, %v351_v27  ;;  %v332_v38 = vadd.f32 %v331_v34, %v232_v25  ;;  %v344_v39 = vadd.f32 %v343_v35, %v242_v24 }
  0xf8   : > { %362 = vst [vmem:[%s193_s17] sm:$0xff] %v354_v30  ;;  %366 = vst [vmem:[%s193_s17 + $0x20] sm:$0xff] %v358_v31  ;;  %v348_v40 = vmul.f32 0.01, %v330_v32  ;;  %v352_v41 = vmul.f32 0.01, %v342_v33 }
  0xf9   : > { %363 = vst [vmem:[%s193_s17 + $0x8] sm:$0xff] %v355_v36  ;;  %367 = vst [vmem:[%s193_s17 + $0x28] sm:$0xff] %v359_v37  ;;  %v349_v42 = vmul.f32 0.01, %v332_v38  ;;  %v353_v43 = vmul.f32 0.01, %v344_v39 }
  0xfa   : > { %v356_v44 = vmax.f32 %v330_v32, %v348_v40  ;;  %v360_v45 = vmax.f32 %v342_v33, %v352_v41 }
  0xfb   : > { %v357_v46 = vmax.f32 %v332_v38, %v349_v42  ;;  %v361_v47 = vmax.f32 %v344_v39, %v353_v43 }
  0xfc   : > { %364 = vst [vmem:[%s193_s17 + $0x10] sm:$0xff] %v356_v44  ;;  %368 = vst [vmem:[%s193_s17 + $0x30] sm:$0xff] %v360_v45 }
  0xfd   : > { %365 = vst [vmem:[%s193_s17 + $0x18] sm:$0xff] %v357_v46  ;;  %369 = vst [vmem:[%s193_s17 + $0x38] sm:$0xff] %v361_v47 }
  0xfe   : > { %557 = shalt.err (!%p554_p3)
}
  0xff   : > { %s558_s30 = scalar_lea.hbm %s703_s25, 1024  ;;  %s562_s6 = scalar_lea.hbm %s753_s3, 2048 }
 0x100   : > { %p559_p4 = scmp.ne.s32.totalorder %s703_s25, %s558_s30  ;;  %p563_p9 = scmp.lt.u32.totalorder %s703_s25, %s753_s3 }
 0x101   : > { %p564_p10 = scmp.lt.u32.totalorder %s562_s6, %s558_s30  ;;  %p566_p12 = scmp.lt.u32.totalorder %s558_s30, %s703_s25 }
 0x102   : > { %p560_p7 = pnand %p559_p4, %p671_p5 }
 0x103   : > { %p565_p11 = por %p564_p10, %p563_p9 }
 0x104   : > { %p561_p8 = pneg %p560_p7 }
 0x105   : > { %p567_p13 = por %p566_p12, %p565_p11 }
 0x107   : > { %p568_p0 = pnand %p567_p13, %p561_p8 }
 0x109   : > { %571 = shalt.err (!%p568_p0)
}
 0x10a   : > { %s611_s9 = smov 256   ;;  %s612_s10 = smov 16  }
 0x10b   : > { %498 = dma.vmem_to_hbm [thread:$0]  (%p671_p5), %s705_s19, 1024, %s703_s25, %s709_s16, %s611_s9, %s611_s9, %s612_s10  }
 0x10c PF: > { %p504_p1 = scmp.ge.s32.totalorder %s606_s15, 2  ;;  %s399_s11 = sand.u32 1, %s594_s12  }
 0x10d   : > { %s400_s17 = scalar_lea.sflag [#allocation3], %s399_s11 }
 0x10e   : > { %p501_p2 = pnand %p504_p1, %p675_p6 }
 0x110   : > { %589 = dma.done.wait (!%p501_p2), %s400_s17, 1024  }
 0x111   : > { %591 = vsyncadd (!%p501_p2), %s400_s17, 4294966272  ;;  %p13_p3 = scmp.ge.s32.totalorder %s658_s18, 4   ;;  %s756_s12 = smov %s598_s13 }
 0x112   : > { %s757_s13 = smov %s602_s14  ;;  %s758_s14 = smov %s669_s21 }
 0x113   : > { %s759_s15 = smov %s658_s18  ;;  %15 = sbr.rel (!%p13_p3) target bundleno = 3 (0x3), region = 73 }
 0x11a   :  { %405 = vsyncpa [#allocation3], 1 }
 0x11b   :  { %407 = vsyncpa [#allocation3 + $0x1], 1 }

</bundles_post_ra>
